<compile_context>
chip_gen: v5e
topology: v5e:2x2
jax: 0.10.0
libtpu: 0.0.40
codegen_flags: <defaults>
</compile_context>

<pallas_src>
import jax
import jax.numpy as jnp
from jax.experimental import pallas as pl
from jax.experimental.pallas import tpu as pltpu


def _imlevel_lf_kernel(std_ref, z_ref, mask_ref, w_ref, b_ref, noise_ref,
                       out_ref):
    B, S, D = z_ref.shape

    # ---- masked mean over the sequence axis (axis=1 of (B, S, D)) ---------
    z = z_ref[...]                             # (B, S, D) f32
    m = mask_ref[...]                          # (B, S, 1) f32, pre-shaped
    num = jnp.sum(z * m, axis=1)               # (B, D)  lane-splat broadcast
    inv = 1.0 / (jnp.sum(m, axis=1) + 1e-20)   # (B, 1)  exact reciprocal
    pooled = num * inv                         # (B, D) == z_tmp before the VAE

    # ---- VAE head: two D-wide bf16 MXU dots, f32 accumulation -------------
    pooled_bf16 = pooled.astype(jnp.bfloat16)
    mu = jnp.dot(pooled_bf16, w_ref[:, 0:D],
                 preferred_element_type=jnp.float32) + b_ref[:, 0:D]
    logsigma = jnp.dot(pooled_bf16, w_ref[:, D:2 * D],
                       preferred_element_type=jnp.float32) + b_ref[:, D:2 * D]

    # ---- reparametrization (f32 on the VPU/EUP) ----------------------------
    std_ratio = std_ref[0]
    sigma = jnp.exp(logsigma * 0.5)
    z_out = mu + sigma * noise_ref[...] * std_ratio

    # ---- single lane-dense output slab: [z_out | mu | logsigma] ------------
    out_ref[:, 0:D] = z_out
    out_ref[:, D:2 * D] = mu
    out_ref[:, 2 * D:3 * D] = logsigma


def fuse_vae_params(w_mu, b_mu, w_sigma, b_sigma,
                    weight_dtype=jnp.bfloat16):
    """Build the fused VAE head parameters ONCE (at init / param update time).

    nn.Linear computes y = x @ W.T + b; we store W pre-transposed and the two
    heads concatenated along the output axis so the forward path does zero
    layout work on the weights.
    """
    D = w_mu.shape[0]
    w_fused = jnp.concatenate(
        [jnp.transpose(w_mu, (1, 0)), jnp.transpose(w_sigma, (1, 0))],
        axis=1).astype(weight_dtype)                       # (D, 2D)
    b_fused = jnp.concatenate([b_mu, b_sigma]).reshape(1, 2 * D).astype(
        jnp.float32)                                       # (1, 2D)
    return w_fused, b_fused


def imlevel_lf_forward(z, text_mask, w_fused, b_fused, noise, std_ratio=1.0):
    """z: (S, B, D) f32, text_mask: (B, S) (PyTorch convention).

    w_fused/b_fused come from fuse_vae_params() (built once, not per call).
    Returns (z_out[1, B, D], [(mu, logsigma)]) matching ImlevelLF.forward
    with vae=True.
    """
    S, B, D = z.shape

    # Cheap layout glue (16 KiB): present z as (B, S, D) so the kernel tiles
    # are fully lane/sublane packed; mask is pre-shaped to (B, S, 1).
    z_bsd = jnp.transpose(z, (1, 0, 2))
    mask = text_mask.astype(jnp.float32)[:, :, None]       # (B, S, 1)

    std_arr = jnp.asarray([std_ratio], dtype=jnp.float32)

    full = lambda shape: pl.BlockSpec(shape, lambda: tuple(0 for _ in shape))

    bytes_accessed = (z_bsd.size * 4 + mask.size * 4 + w_fused.size *
                      w_fused.dtype.itemsize + b_fused.size * 4 +
                      noise.size * 4 + B * 3 * D * 4)
    cost = pl.CostEstimate(flops=2 * B * D * 2 * D,
                           transcendentals=B * D,
                           bytes_accessed=bytes_accessed)

    out = pl.pallas_call(
        _imlevel_lf_kernel,
        out_shape=jax.ShapeDtypeStruct((B, 3 * D), jnp.float32),
        in_specs=[
            pl.BlockSpec(memory_space=pltpu.MemorySpace.SMEM),  # std_ratio
            full((B, S, D)),       # z (B, S, D) f32
            full((B, S, 1)),       # mask (B, S, 1) f32
            full((D, 2 * D)),      # fused weight [w_mu^T | w_sigma^T] bf16
            full((1, 2 * D)),      # fused bias f32
            full((B, D)),          # noise f32
        ],
        out_specs=full((B, 3 * D)),
        cost_estimate=cost,
    )(std_arr, z_bsd, mask, w_fused, b_fused, noise)

    z_out = out[:, 0:D]
    mu = out[:, D:2 * D]
    logsigma = out[:, 2 * D:3 * D]

    vae_item = [(mu, logsigma)]
    return z_out[None, :, :], vae_item


def reference_forward(z, text_mask, w_mu, b_mu, w_sigma, b_sigma, noise,
                      std_ratio=1.0):
    """Pure-JAX f32 reference mirroring the PyTorch semantics exactly."""
    S, B, D = z.shape
    m = jnp.transpose(text_mask, (1, 0))[:, :, None]          # (S, B, 1)
    m = jnp.broadcast_to(m, (S, B, D))
    pooled = jnp.sum(z * m, axis=0) / (jnp.sum(m, axis=0) + 1e-20)
    mu = pooled @ w_mu.T + b_mu
    logsigma = pooled @ w_sigma.T + b_sigma
    sigma = jnp.exp(logsigma / 2.0)
    z_out = mu + sigma * noise * std_ratio
    return z_out[None, :, :], mu, logsigma


if __name__ == "__main__":
    key = jax.random.PRNGKey(0)
    S, B, D = 8, 2, 256          # d_model fixed to 256 by the VAE default
    std_ratio = 1.0

    k_z, k_mask, k_wmu, k_wsg, k_noise = jax.random.split(key, 5)

    z = jax.random.normal(k_z, (S, B, D), dtype=jnp.float32)
    # binary text mask, shape (B, S) like the PyTorch call site
    text_mask = (jax.random.uniform(k_mask, (B, S)) > 0.3).astype(jnp.float32)

    # Deterministic parameter init matching VAE._init_embeddings
    w_mu = 0.001 * jax.random.normal(k_wmu, (D, D), dtype=jnp.float32)
    b_mu = jnp.zeros((D,), dtype=jnp.float32)
    w_sigma = 0.001 * jax.random.normal(k_wsg, (D, D), dtype=jnp.float32)
    b_sigma = jnp.zeros((D,), dtype=jnp.float32)

    # Fused/pre-transposed/bf16 params are built ONCE here (init time),
    # not inside the per-call forward path.
    w_fused, b_fused = fuse_vae_params(w_mu, b_mu, w_sigma, b_sigma)
    w_fused = jax.block_until_ready(w_fused)

    # randn_like noise is generated once and shared with the reference so the
    # check is deterministic (stochastic reparametrization trick).
    noise = jax.random.normal(k_noise, (B, D), dtype=jnp.float32)

    (z_out, vae_item) = imlevel_lf_forward(
        z, text_mask, w_fused, b_fused, noise, std_ratio)
    jax.block_until_ready(z_out)

    ref_z, ref_mu, ref_ls = reference_forward(
        z, text_mask, w_mu, b_mu, w_sigma, b_sigma, noise, std_ratio)

    mu, logsigma = vae_item[0]
    assert z_out.shape == (1, B, D)
    # bf16 weights in the kernel vs f32 reference -> relaxed tolerances.
    assert jnp.allclose(z_out, ref_z, atol=1e-3, rtol=1e-2)
    assert jnp.allclose(mu, ref_mu, atol=1e-3, rtol=1e-2)
    assert jnp.allclose(logsigma, ref_ls, atol=1e-3, rtol=1e-2)

    print("KERNEL_OK")
</pallas_src>

<mosaic_0001>
module attributes {stable_mosaic.version = 11 : i64} {
  func.func @_imlevel_lf_kernel(%arg0: memref<1xf32, #tpu.memory_space<smem>>, %arg1: memref<2x8x256xf32, #tpu.memory_space<vmem>>, %arg2: memref<2x8x1xf32, #tpu.memory_space<vmem>>, %arg3: memref<256x512xbf16, #tpu.memory_space<vmem>>, %arg4: memref<1x512xf32, #tpu.memory_space<vmem>>, %arg5: memref<2x256xf32, #tpu.memory_space<vmem>>, %arg6: memref<2x768xf32, #tpu.memory_space<vmem>>) attributes {dimension_semantics = [], scalar_prefetch = 0 : i64, scratch_operands = 0 : i64, tpu.core_type = #tpu.core_type<tc>} {
    %c0 = arith.constant 0 : index
    %c0_0 = arith.constant 0 : index
    %c0_1 = arith.constant 0 : index
    %0 = vector.load %arg1[%c0, %c0_0, %c0_1] : memref<2x8x256xf32, #tpu.memory_space<vmem>>, vector<2x8x256xf32>
    %c0_2 = arith.constant 0 : index
    %c0_3 = arith.constant 0 : index
    %c0_4 = arith.constant 0 : index
    %1 = vector.load %arg2[%c0_2, %c0_3, %c0_4] : memref<2x8x1xf32, #tpu.memory_space<vmem>>, vector<2x8x1xf32>
    %2 = vector.broadcast %1 : vector<2x8x1xf32> to vector<2x8x256xf32>
    %3 = arith.mulf %0, %2 : vector<2x8x256xf32>
    %cst = arith.constant dense<0.000000e+00> : vector<2x256xf32>
    %4 = vector.multi_reduction <add>, %3, %cst [1] : vector<2x8x256xf32> to vector<2x256xf32>
    %cst_5 = arith.constant dense<0.000000e+00> : vector<2x1xf32>
    %5 = vector.multi_reduction <add>, %1, %cst_5 [1] : vector<2x8x1xf32> to vector<2x1xf32>
    %cst_6 = arith.constant 9.99999968E-21 : f32
    %6 = vector.broadcast %cst_6 : f32 to vector<2x1xf32>
    %7 = arith.addf %5, %6 : vector<2x1xf32>
    %cst_7 = arith.constant 1.000000e+00 : f32
    %8 = vector.broadcast %cst_7 : f32 to vector<2x1xf32>
    %9 = arith.divf %8, %7 : vector<2x1xf32>
    %10 = vector.broadcast %9 : vector<2x1xf32> to vector<2x256xf32>
    %11 = arith.mulf %4, %10 : vector<2x256xf32>
    %12 = arith.truncf %11 : vector<2x256xf32> to vector<2x256xbf16>
    %c0_8 = arith.constant 0 : index
    %c0_9 = arith.constant 0 : index
    %13 = vector.load %arg3[%c0_8, %c0_9] : memref<256x512xbf16, #tpu.memory_space<vmem>>, vector<256x256xbf16>
    %cst_10 = arith.constant dense<0.000000e+00> : vector<2x256xf32>
    %14 = tpu.matmul %12, %13, %cst_10 {dimension_numbers = #tpu.dot_dimension_numbers<[1], [0], [0], [1], [0, 0, 1, 1], [], []>} : vector<2x256xbf16>, vector<256x256xbf16>, vector<2x256xf32> -> vector<2x256xf32>
    %c0_11 = arith.constant 0 : index
    %c0_12 = arith.constant 0 : index
    %15 = vector.load %arg4[%c0_11, %c0_12] : memref<1x512xf32, #tpu.memory_space<vmem>>, vector<1x256xf32>
    %16 = vector.broadcast %15 : vector<1x256xf32> to vector<2x256xf32>
    %17 = arith.addf %14, %16 : vector<2x256xf32>
    %c0_13 = arith.constant 0 : index
    %c256 = arith.constant 256 : index
    %18 = vector.load %arg3[%c0_13, %c256] : memref<256x512xbf16, #tpu.memory_space<vmem>>, vector<256x256xbf16>
    %cst_14 = arith.constant dense<0.000000e+00> : vector<2x256xf32>
    %19 = tpu.matmul %12, %18, %cst_14 {dimension_numbers = #tpu.dot_dimension_numbers<[1], [0], [0], [1], [0, 0, 1, 1], [], []>} : vector<2x256xbf16>, vector<256x256xbf16>, vector<2x256xf32> -> vector<2x256xf32>
    %c0_15 = arith.constant 0 : index
    %c256_16 = arith.constant 256 : index
    %20 = vector.load %arg4[%c0_15, %c256_16] : memref<1x512xf32, #tpu.memory_space<vmem>>, vector<1x256xf32>
    %21 = vector.broadcast %20 : vector<1x256xf32> to vector<2x256xf32>
    %22 = arith.addf %19, %21 : vector<2x256xf32>
    %c0_17 = arith.constant 0 : index
    %23 = memref.load %arg0[%c0_17] : memref<1xf32, #tpu.memory_space<smem>>
    %cst_18 = arith.constant 5.000000e-01 : f32
    %24 = vector.broadcast %cst_18 : f32 to vector<2x256xf32>
    %25 = arith.mulf %22, %24 : vector<2x256xf32>
    %26 = math.exp %25 : vector<2x256xf32>
    %c0_19 = arith.constant 0 : index
    %c0_20 = arith.constant 0 : index
    %27 = vector.load %arg5[%c0_19, %c0_20] : memref<2x256xf32, #tpu.memory_space<vmem>>, vector<2x256xf32>
    %28 = arith.mulf %26, %27 : vector<2x256xf32>
    %29 = vector.broadcast %23 : f32 to vector<2x256xf32>
    %30 = arith.mulf %28, %29 : vector<2x256xf32>
    %31 = arith.addf %17, %30 : vector<2x256xf32>
    %c0_21 = arith.constant 0 : index
    %c0_22 = arith.constant 0 : index
    %32 = vector.load %arg6[%c0_21, %c0_22] : memref<2x768xf32, #tpu.memory_space<vmem>>, vector<2x256xf32>
    tpu.vector_store %arg6[%c0_21, %c0_22], %31 {strides = array<i32>} : memref<2x768xf32, #tpu.memory_space<vmem>>, vector<2x256xf32>,
    %c0_23 = arith.constant 0 : index
    %c256_24 = arith.constant 256 : index
    %33 = vector.load %arg6[%c0_23, %c256_24] : memref<2x768xf32, #tpu.memory_space<vmem>>, vector<2x256xf32>
    tpu.vector_store %arg6[%c0_23, %c256_24], %17 {strides = array<i32>} : memref<2x768xf32, #tpu.memory_space<vmem>>, vector<2x256xf32>,
    %c0_25 = arith.constant 0 : index
    %c512 = arith.constant 512 : index
    %34 = vector.load %arg6[%c0_25, %c512] : memref<2x768xf32, #tpu.memory_space<vmem>>, vector<2x256xf32>
    tpu.vector_store %arg6[%c0_25, %c512], %22 {strides = array<i32>} : memref<2x768xf32, #tpu.memory_space<vmem>>, vector<2x256xf32>,
    return
  }
}

</mosaic_0001>

<bundles_post_ra>
// kernel: tpu_custom_call.1
= control target key start
LH: loop header
LB: loop body
LE: loop exit
PB: predicated region body
PF: predicated region fallthrough
CT: control target
= control target key end

     0   :  { %12 = vsyncpa [#allocation4], 0  ;;  %s1224_s0 = inlined_call_operand.<no memory space> [shape: f32[1], index: 0, kind: input, shape index: {}]   ;;  %s1225_s1 = inlined_call_operand.hbm [shape: f32[2,8,256], index: 1, kind: input, shape index: {}]   ;;  %s1226_s2 = inlined_call_operand.vmem [shape: f32[2,8,1], index: 2, kind: input, shape index: {}]   ;;  %s1227_s3 = inlined_call_operand.hbm [shape: bf16[256,512], index: 3, kind: input, shape index: {}]   ;;  %s1228_s4 = inlined_call_operand.vmem [shape: f32[1,512], index: 4, kind: input, shape index: {}]   ;;  %s1229_s5 = inlined_call_operand.vmem [shape: f32[2,256], index: 5, kind: input, shape index: {}]   ;;  %s1230_s6 = inlined_call_operand.hbm [shape: f32[2,768], index: 6, kind: output, shape index: {}]  }
   0x1   :  { %13 = vsyncpa [#allocation7], 0 }
   0x2   :  { %14 = vsyncpa [#allocation5], 0  ;;  %s21_s23 = sshll.u32 %s1225_s1, 4  ;;  %s1153_s24 = smov [#allocation3]   ;;  %s22_s23 = int_to_ptr.hbm [resolvable:$true] %s21_s23 }
   0x3   :  { %s23_s25 = sshll.u32 %s1153_s24, 4  ;;  %s36_s28 = sshll.u32 %s1227_s3, 4  ;;  %s24_s25 = int_to_ptr.vmem [resolvable:$true] %s23_s25  ;;  %s37_s28 = int_to_ptr.hbm [resolvable:$true] %s36_s28 }
   0x4   :  { %s1154_s29 = smov 256   ;;  %s1155_s30 = smov 16  }
   0x5   :  { %29 = dma.hbm_to_vmem [thread:$0]  %s22_s23, 512, %s24_s25, [#allocation4], %s1154_s29, %s1154_s29, %s1155_s30  }
   0x6   :  { %s1156_s7 = smov [#allocation6]  }
   0x7   :  { %s38_s8 = sshll.u32 %s1156_s7, 4  ;;  %s39_s8 = int_to_ptr.vmem [resolvable:$true] %s38_s8 }
   0x8   :  { %44 = dma.hbm_to_vmem [thread:$0]  %s37_s28, 8192, %s39_s8, [#allocation7], %s1154_s29, %s1154_s29, %s1155_s30  }
   0x9   :  { %1147 = dma.done.wait [#allocation4], 512  }
   0xa   :  { %1148 = vsyncadd [#allocation4], 4294966784 }
   0xb   :  { %1149 = dma.done.wait [#allocation7], 8192  }
   0xc   :  { %1150 = vsyncadd [#allocation7], 4294959104  ;;  %v1157_v0 = vmov 0   ;;  %vm101_vm0 = vcmask 7168   ;;  %v61_v1 = vld [vmem:[%s1226_s2] sm:$0xff]  ;;  %v62_v2 = vld [vmem:[%s1226_s2 + $0x8] sm:$0xff] }
   0xd   :  { %1065 = vset.pattern.permute.xlu0 %v1157_v0  ;;  %1066 = vset.pattern.permute.xlu1 %v1157_v0  ;;  %v102_v3 = vsel %vm101_vm0, %v61_v1, 0.0  ;;  %v109_v4 = vsel %vm101_vm0, %v62_v2, 0.0  ;;  %v797_v39 = vld [vmem:[#allocation6 + $0xe0] sm:$0xf]  ;;  %v1010_v40 = vld [vmem:[#allocation6 + $0xec] sm:$0xf0] }
   0xe   :  { %65 = vperm.xlu0 %1065, %v61_v1   ;;  %v103_v5 = vrot.slane %v102_v3, 4  ;;  %v110_v6 = vrot.slane %v109_v4, 4  ;;  %v861_v41 = vld [vmem:[#allocation6 + $0x1e0] sm:$0xf]  ;;  %v798_v42 = vor.u32 %v1010_v40, %v797_v39  ;;  %v1026_v43 = vld [vmem:[#allocation6 + $0x1ec] sm:$0xf0] }
   0xf   :  { %v1009_v44 = vld [vmem:[#allocation6 + $0xe4] sm:$0xf]  ;;  %v799_v45 = vld [vmem:[#allocation6 + $0xf0] sm:$0xf0]  ;;  %v862_v46 = vor.u32 %v1026_v43, %v861_v41  ;;  %v789_v51 = vld [vmem:[#allocation6 + $0xc0] sm:$0xf] }
  0x10   :  { %v104_v7 = vadd.f32 %v103_v5, %v102_v3  ;;  %v111_v8 = vadd.f32 %v110_v6, %v109_v4  ;;  %v802_v47 = vor.u32 %v1009_v44, %v799_v45  ;;  %v1025_v48 = vld [vmem:[#allocation6 + $0x1e4] sm:$0xf]  ;;  %v863_v49 = vld [vmem:[#allocation6 + $0x1f0] sm:$0xf0]  ;;  %379 = vmatpush.bf16.msra.mxu0 %v798_v42  ;;  %v1008_v52 = vld [vmem:[#allocation6 + $0xcc] sm:$0xf0] }
  0x11   :  { %v866_v50 = vor.u32 %v1025_v48, %v863_v49  ;;  %392 = vmatpush.bf16.msra.mxu1 %v862_v46  ;;  %v853_v53 = vld [vmem:[#allocation6 + $0x1c0] sm:$0xf]  ;;  %v790_v54 = vor.u32 %v1008_v52, %v789_v51  ;;  %v1024_v55 = vld [vmem:[#allocation6 + $0x1cc] sm:$0xf0]  ;;  %v1007_v56 = vld [vmem:[#allocation6 + $0xc4] sm:$0xf] }
  0x12   :  { %v105_v9 = vrot.slane %v104_v7, 2  ;;  %v112_v10 = vrot.slane %v111_v8, 2  ;;  %405 = vmatpush.bf16.msra.mxu2 %v802_v47  ;;  %v791_v57 = vld [vmem:[#allocation6 + $0xd0] sm:$0xf0]  ;;  %v854_v58 = vor.u32 %v1024_v55, %v853_v53  ;;  %v1023_v60 = vld [vmem:[#allocation6 + $0x1c4] sm:$0xf] }
  0x13   :  { %418 = vmatpush.bf16.msra.mxu3 %v866_v50  ;;  %v794_v59 = vor.u32 %v1007_v56, %v791_v57  ;;  %v855_v61 = vld [vmem:[#allocation6 + $0x1d0] sm:$0xf0]  ;;  %v781_v63 = vld [vmem:[#allocation6 + $0xa0] sm:$0xf]  ;;  %v1006_v0 = vld [vmem:[#allocation6 + $0xac] sm:$0xf0] }
  0x14   :  { %v106_v11 = vadd.f32 %v105_v9, %v104_v7  ;;  %v113_v12 = vadd.f32 %v112_v10, %v111_v8  ;;  %380 = vmatpush.bf16.msra.mxu0 %v790_v54  ;;  %v858_v62 = vor.u32 %v1023_v60, %v855_v61  ;;  %v845_v1 = vld [vmem:[#allocation6 + $0x1a0] sm:$0xf]  ;;  %v1022_v3 = vld [vmem:[#allocation6 + $0x1ac] sm:$0xf0]  ;;  %v1005_v4 = vld [vmem:[#allocation6 + $0xa4] sm:$0xf] }
  0x15   :  { %393 = vmatpush.bf16.msra.mxu1 %v854_v58  ;;  %v783_v5 = vld [vmem:[#allocation6 + $0xb0] sm:$0xf0]  ;;  %v846_v6 = vor.u32 %v1022_v3, %v845_v1  ;;  %v1021_v8 = vld [vmem:[#allocation6 + $0x1a4] sm:$0xf]  ;;  %v749_v46 = vld [vmem:[#allocation6 + $0x20] sm:$0xf] }
  0x16   :  { %70 = vperm.xlu0 %1065, %v62_v2   ;;  %v107_v13 = vrot.slane %v106_v11, 1  ;;  %v114_v14 = vrot.slane %v113_v12, 1  ;;  %406 = vmatpush.bf16.msra.mxu2 %v794_v59  ;;  %v782_v2 = vor.u32 %v1006_v0, %v781_v63  ;;  %v786_v7 = vor.u32 %v1005_v4, %v783_v5  ;;  %v847_v9 = vld [vmem:[#allocation6 + $0x1b0] sm:$0xf0]  ;;  %v999_v39 = vld [vmem:[#allocation6 + $0x44] sm:$0xf] }
  0x17   :  { %419 = vmatpush.bf16.msra.mxu3 %v858_v62  ;;  %v850_v10 = vor.u32 %v1021_v8, %v847_v9  ;;  %v759_v41 = vld [vmem:[#allocation6 + $0x50] sm:$0xf0]  ;;  %v1015_v42 = vld [vmem:[#allocation6 + $0x144] sm:$0xf]  ;;  %v998_v47 = vld [vmem:[#allocation6 + $0x2c] sm:$0xf0] }
  0x18   :  { %v108_v15 = vadd.f32 %v107_v13, %v106_v11  ;;  %v115_v16 = vadd.f32 %v114_v14, %v113_v12  ;;  %381 = vmatpush.bf16.msra.mxu0 %v782_v2  ;;  %v773_v11 = vld [vmem:[#allocation6 + $0x80] sm:$0xf]  ;;  %v1004_v12 = vld [vmem:[#allocation6 + $0x8c] sm:$0xf0]  ;;  %v823_v43 = vld [vmem:[#allocation6 + $0x150] sm:$0xf0]  ;;  %v762_v45 = vor.u32 %v999_v39, %v759_v41  ;;  %v750_v55 = vor.u32 %v998_v47, %v749_v46 }
  0x19   :  { %394 = vmatpush.bf16.msra.mxu1 %v846_v6  ;;  %v837_v13 = vld [vmem:[#allocation6 + $0x180] sm:$0xf]  ;;  %v774_v14 = vor.u32 %v1004_v12, %v773_v11  ;;  %v826_v49 = vor.u32 %v1015_v42, %v823_v43  ;;  %v1014_v50 = vld [vmem:[#allocation6 + $0x12c] sm:$0xf0]  ;;  %v997_v51 = vld [vmem:[#allocation6 + $0x24] sm:$0xf] }
  0x1a   :  { %v116_v17 = vadd.f32 1e-20, %v108_v15  ;;  %v117_v18 = vadd.f32 1e-20, %v115_v16  ;;  %407 = vmatpush.bf16.msra.mxu2 %v786_v7  ;;  %v1020_v15 = vld [vmem:[#allocation6 + $0x18c] sm:$0xf0] }
  0x1b   :  { %420 = vmatpush.bf16.msra.mxu3 %v850_v10  ;;  %v1003_v16 = vld [vmem:[#allocation6 + $0x84] sm:$0xf]  ;;  %v813_v48 = vld [vmem:[#allocation6 + $0x120] sm:$0xf]  ;;  %v751_v52 = vld [vmem:[#allocation6 + $0x30] sm:$0xf0] }
  0x1c   :  { %1067 = vrcp.f32 %v116_v17  ;;  %v129_v22 = vand.u32 2147483648, %v116_v17  ;;  %vm123_vm1 = vweird.f32 %v116_v17  ;;  %v127_v25 = vand.u32 2147483647, %v116_v17  ;;  %382 = vmatpush.bf16.msra.mxu0 %v774_v14  ;;  %v1013_v53 = vld [vmem:[#allocation6 + $0x124] sm:$0xf]  ;;  %s1158_s16 = smov [#allocation8]  }
  0x1d   :  { %1069 = vrcp.f32 %v117_v18  ;;  %vm138_vm5 = vweird.f32 %v117_v18  ;;  %v144_v31 = vand.u32 2147483648, %v117_v18  ;;  %v142_v34 = vand.u32 2147483647, %v117_v18  ;;  %v815_v54 = vld [vmem:[#allocation6 + $0x130] sm:$0xf0]  ;;  %v57_v8 = vld [vmem:[#allocation3] sm:$0xff] }
  0x1e   :  { %v130_v28 = vor.u32 1.1754944e-38, %v129_v22  ;;  %vm128_vm4 = vcmp.eq.f32.partialorder %v127_v25, 8.507059e+37  ;;  %v765_v22 = vld [vmem:[#allocation6 + $0x60] sm:$0xf]  ;;  %v814_v56 = vor.u32 %v1014_v50, %v813_v48  ;;  %v754_v57 = vor.u32 %v997_v51, %v751_v52  ;;  %v996_v60 = vld [vmem:[#allocation6 + $0xc] sm:$0xf0] }
  0x1f   :  { %v145_v36 = vor.u32 1.1754944e-38, %v144_v31  ;;  %vm143_vm8 = vcmp.eq.f32.partialorder %v142_v34, 8.507059e+37  ;;  %v829_v25 = vld [vmem:[#allocation6 + $0x160] sm:$0xf]  ;;  %v1017_v31 = vld [vmem:[#allocation6 + $0x164] sm:$0xf]  ;;  %v818_v58 = vor.u32 %v1013_v53, %v815_v54 }
  0x20   :  { %v757_v34 = vld [vmem:[#allocation6 + $0x40] sm:$0xf]  ;;  %v1012_v0 = vld [vmem:[#allocation6 + $0x10c] sm:$0xf0]  ;;  %v995_v1 = vld [vmem:[#allocation6 + $0x4] sm:$0xf] }
  0x21   :  { %v741_v59 = vld [vmem:[#allocation6] sm:$0xf]  ;;  %v743_v2 = vld [vmem:[#allocation6 + $0x10] sm:$0xf0]  ;;  %v1011_v5 = vld [vmem:[#allocation6 + $0x104] sm:$0xf] }
  0x22   :  { %v1068_v19 = vpop.eup %1067  ;;  %v805_v61 = vld [vmem:[#allocation6 + $0x100] sm:$0xf]  ;;  %v742_v63 = vor.u32 %v996_v60, %v741_v59  ;;  %v746_v4 = vor.u32 %v995_v1, %v743_v2  ;;  %v807_v6 = vld [vmem:[#allocation6 + $0x110] sm:$0xf0]  ;;  %v925_v7 = vld [vmem:[#allocation6 + $0xe8] sm:$0xf] }
  0x23   :  { %v1070_v20 = vpop.eup %1069  ;;  %v119_v21 = vmul.f32 %v1068_v19, %v116_v17  ;;  %vm124_vm2 = vweird.f32 %v1068_v19  ;;  %v775_v17 = vld [vmem:[#allocation6 + $0x90] sm:$0xf0]  ;;  %v806_v3 = vor.u32 %v1012_v0, %v805_v61  ;;  %v810_v9 = vor.u32 %v1011_v5, %v807_v6  ;;  %v1042_v10 = vld [vmem:[#allocation6 + $0xf4] sm:$0xf0]  ;;  %v989_v11 = vld [vmem:[#allocation6 + $0x1e8] sm:$0xf] }
  0x24   :  { %v134_v23 = vmul.f32 %v1070_v20, %v117_v18  ;;  %vm125_vm3 = vmor %vm123_vm1, %vm124_vm2  ;;  %vm139_vm6 = vweird.f32 %v1070_v20  ;;  %v838_v18 = vor.u32 %v1020_v15, %v837_v13  ;;  %v1058_v12 = vld [vmem:[#allocation6 + $0x1f4] sm:$0xf0]  ;;  %v58_v13 = vld [vmem:[#allocation3 + $0x8] sm:$0xff]  ;;  %v926_v14 = vor.u32 %v1042_v10, %v925_v7  ;;  %s726_s17 = sshll.u32 %s1158_s16, 4  ;;  %s728_s20 = sshll.u32 %s1230_s6, 4  ;;  %s727_s17 = int_to_ptr.vmem [resolvable:$true] %s726_s17  ;;  %s729_s20 = int_to_ptr.hbm [resolvable:$true] %s728_s20 }
  0x25   :  { %v120_v24 = vsub.f32 1.0, %v119_v21  ;;  %vm140_vm7 = vmor %vm138_vm5, %vm139_vm6  ;;  %v839_v21 = vld [vmem:[#allocation6 + $0x190] sm:$0xf0]  ;;  %v990_v15 = vor.u32 %v1058_v12, %v989_v11  ;;  %v1038_v39 = vld [vmem:[#allocation6 + $0xb4] sm:$0xf0]  ;;  %vm212_vm9 = vcmask 1041409  }
  0x26   :  { %v135_v26 = vsub.f32 1.0, %v134_v23  ;;  %395 = vmatpush.bf16.msra.mxu1 %v838_v18  ;;  %v1054_v42 = vld [vmem:[#allocation6 + $0x1b4] sm:$0xf0]  ;;  %v1037_v43 = vld [vmem:[#allocation6 + $0xac] sm:$0xf]  ;;  %vm705_vm10 = vcmask 1041408  }
  0x27   :  { %v121_v27 = vmul.f32 %v1068_v19, %v120_v24  ;;  %v1002_v24 = vld [vmem:[#allocation6 + $0x6c] sm:$0xf0]  ;;  %v1053_v48 = vld [vmem:[#allocation6 + $0x1ac] sm:$0xf]  ;;  %v903_v60 = vld [vmem:[#allocation6 + $0x98] sm:$0xf0] }
  0x28   :  { %v136_v29 = vmul.f32 %v1070_v20, %v135_v26  ;;  %v1018_v26 = vld [vmem:[#allocation6 + $0x16c] sm:$0xf0]  ;;  %v1035_v59 = vld [vmem:[#allocation6 + $0x8c] sm:$0xf]  ;;  %v967_v1 = vld [vmem:[#allocation6 + $0x198] sm:$0xf0] }
  0x29   :  { %v122_v30 = vadd.f32 %v1068_v19, %v121_v27  ;;  %v766_v27 = vor.u32 %v1002_v24, %v765_v22  ;;  %v981_v24 = vld [vmem:[#allocation6 + $0x1c8] sm:$0xf]  ;;  %v1051_v0 = vld [vmem:[#allocation6 + $0x18c] sm:$0xf]  ;;  %v1050_v11 = vld [vmem:[#allocation6 + $0x174] sm:$0xf0] }
  0x2a   :  { %v137_v33 = vadd.f32 %v1070_v20, %v136_v29  ;;  %v1001_v29 = vld [vmem:[#allocation6 + $0x64] sm:$0xf]  ;;  %v893_v7 = vld [vmem:[#allocation6 + $0x68] sm:$0xf]  ;;  %v1033_v12 = vld [vmem:[#allocation6 + $0x6c] sm:$0xf] }
  0x2b   :  { %v126_v32 = vsel %vm125_vm3, %v1068_v19, %v122_v30  ;;  %v778_v19 = vor.u32 %v1003_v16, %v775_v17  ;;  %v767_v30 = vld [vmem:[#allocation6 + $0x70] sm:$0xf0]  ;;  %383 = vmatpush.bf16.msra.mxu0 %v766_v27  ;;  %v1041_v16 = vld [vmem:[#allocation6 + $0xec] sm:$0xf]  ;;  %v927_v17 = vld [vmem:[#allocation6 + $0xf8] sm:$0xf0] }
  0x2c   :  { %v131_v35 = vsel %vm128_vm4, %v130_v28, %v126_v32  ;;  %v141_v37 = vsel %vm140_vm7, %v1070_v20, %v137_v33  ;;  %v1019_v20 = vld [vmem:[#allocation6 + $0x184] sm:$0xf]  ;;  %v830_v28 = vor.u32 %v1018_v26, %v829_v25  ;;  %v770_v32 = vor.u32 %v1001_v29, %v767_v30  ;;  %v831_v33 = vld [vmem:[#allocation6 + $0x170] sm:$0xf0]  ;;  %v1056_v25 = vld [vmem:[#allocation6 + $0x1d4] sm:$0xf0] }
  0x2d   :  { %150 = vperm.xlu1 %1066, %v131_v35   ;;  %v146_v38 = vsel %vm143_vm8, %v145_v36, %v141_v37  ;;  %v842_v23 = vor.u32 %v1019_v20, %v839_v21  ;;  %408 = vmatpush.bf16.msra.mxu2 %v778_v19  ;;  %v1000_v35 = vld [vmem:[#allocation6 + $0x4c] sm:$0xf0]  ;;  %v834_v36 = vor.u32 %v1017_v31, %v831_v33  ;;  %v821_v37 = vld [vmem:[#allocation6 + $0x140] sm:$0xf]  ;;  %v1057_v19 = vld [vmem:[#allocation6 + $0x1ec] sm:$0xf] }
  0x2e   :  { %v758_v40 = vor.u32 %v1000_v35, %v757_v34  ;;  %396 = vmatpush.bf16.msra.mxu1 %v830_v28  ;;  %v930_v18 = vor.u32 %v1041_v16, %v927_v17  ;;  %v991_v20 = vld [vmem:[#allocation6 + $0x1f8] sm:$0xf0]  ;;  %v917_v21 = vld [vmem:[#allocation6 + $0xc8] sm:$0xf]  ;;  %v982_v27 = vor.u32 %v1056_v25, %v981_v24  ;;  %v1039_v28 = vld [vmem:[#allocation6 + $0xcc] sm:$0xf] }
  0x2f   :  { %421 = vmatpush.bf16.msra.mxu3 %v842_v23  ;;  %v994_v22 = vor.u32 %v1057_v19, %v991_v20  ;;  %v1040_v23 = vld [vmem:[#allocation6 + $0xd4] sm:$0xf0]  ;;  %v919_v29 = vld [vmem:[#allocation6 + $0xd8] sm:$0xf0]  ;;  %v1055_v30 = vld [vmem:[#allocation6 + $0x1cc] sm:$0xf] }
  0x30   :  { %384 = vmatpush.bf16.msra.mxu0 %v758_v40  ;;  %v918_v26 = vor.u32 %v1040_v23, %v917_v21  ;;  %v59_v33 = vld [vmem:[#allocation3 + $0x10] sm:$0xff]  ;;  %v60_v34 = vld [vmem:[#allocation3 + $0x18] sm:$0xff]  ;;  %v922_v35 = vor.u32 %v1039_v28, %v919_v29  ;;  %v973_v40 = vld [vmem:[#allocation6 + $0x1a8] sm:$0xf] }
  0x31   :  { %409 = vmatpush.bf16.msra.mxu2 %v770_v32  ;;  %v974_v46 = vor.u32 %v1054_v42, %v973_v40  ;;  %v959_v19 = vld [vmem:[#allocation6 + $0x178] sm:$0xf0]  ;;  %v885_v21 = vld [vmem:[#allocation6 + $0x48] sm:$0xf]  ;;  %v1031_v28 = vld [vmem:[#allocation6 + $0x4c] sm:$0xf] }
  0x32   :  { %v949_v23 = vld [vmem:[#allocation6 + $0x148] sm:$0xf]  ;;  %v887_v29 = vld [vmem:[#allocation6 + $0x58] sm:$0xf0] }
  0x33   :  { %422 = vmatpush.bf16.msra.mxu3 %v834_v36  ;;  %v983_v36 = vld [vmem:[#allocation6 + $0x1d8] sm:$0xf0] }
  0x34   :  { %385 = vmatpush.bf16.msra.mxu0 %v750_v55  ;;  %v901_v55 = vld [vmem:[#allocation6 + $0x88] sm:$0xf]  ;;  %v879_v40 = vld [vmem:[#allocation6 + $0x38] sm:$0xf0] }
  0x35   :  { %155 = vperm.xlu1 %1066, %v146_v38   ;;  %v1016_v38 = vld [vmem:[#allocation6 + $0x14c] sm:$0xf0]  ;;  %410 = vmatpush.bf16.msra.mxu2 %v762_v45 }
  0x36   :  { %v822_v44 = vor.u32 %v1016_v38, %v821_v37  ;;  %v986_v37 = vor.u32 %v1055_v30, %v983_v36  ;;  %v909_v38 = vld [vmem:[#allocation6 + $0xa8] sm:$0xf]  ;;  %v1030_v36 = vld [vmem:[#allocation6 + $0x34] sm:$0xf0] }
  0x37   :  { %423 = vmatpush.bf16.msra.mxu3 %v826_v49  ;;  %v910_v45 = vor.u32 %v1038_v39, %v909_v38  ;;  %v975_v49 = vld [vmem:[#allocation6 + $0x1b8] sm:$0xf0]  ;;  %v1046_v38 = vld [vmem:[#allocation6 + $0x134] sm:$0xf0]  ;;  %v1029_v39 = vld [vmem:[#allocation6 + $0x2c] sm:$0xf] }
  0x38   :  { %397 = vmatpush.bf16.msra.mxu1 %v822_v44  ;;  %386 = vmatpush.bf16.msra.mxu0 %v742_v63  ;;  %v911_v44 = vld [vmem:[#allocation6 + $0xb8] sm:$0xf0]  ;;  %v978_v54 = vor.u32 %v1053_v48, %v975_v49  ;;  %v906_v63 = vor.u32 %v1035_v59, %v903_v60  ;;  %v882_v48 = vor.u32 %v1029_v39, %v879_v40  ;;  %v869_v49 = vld [vmem:[#allocation6 + $0x8] sm:$0xf]  ;;  %v463_v40 = vld [vmem:[%s1228_s4 + $0x2] sm:$0x3] }
  0x39   :  { %411 = vmatpush.bf16.msra.mxu2 %v754_v57  ;;  %v914_v47 = vor.u32 %v1037_v43, %v911_v44  ;;  %v965_v57 = vld [vmem:[#allocation6 + $0x188] sm:$0xf] }
  0x3b   :  { %424 = vmatpush.bf16.msra.mxu3 %v818_v58  ;;  %v1052_v58 = vld [vmem:[#allocation6 + $0x194] sm:$0xf0] }
  0x3c   :  { %398 = vmatpush.bf16.msra.mxu1 %v814_v56  ;;  %629 = vmatpush.bf16.msrb.mxu0 %v926_v14  ;;  %v1036_v56 = vld [vmem:[#allocation6 + $0x94] sm:$0xf0] }
  0x3d   :  { %412 = vmatpush.bf16.msra.mxu2 %v746_v4  ;;  %v902_v61 = vor.u32 %v1036_v56, %v901_v55  ;;  %v970_v4 = vor.u32 %v1051_v0, %v967_v1  ;;  %v1027_v55 = vld [vmem:[#allocation6 + $0xc] sm:$0xf]  ;;  %v871_v56 = vld [vmem:[#allocation6 + $0x18] sm:$0xf0] }
  0x3f   :  { %425 = vmatpush.bf16.msra.mxu3 %v810_v9  ;;  %v957_v9 = vld [vmem:[#allocation6 + $0x168] sm:$0xf] }
  0x40   :  { %399 = vmatpush.bf16.msra.mxu1 %v806_v3  ;;  %630 = vmatpush.bf16.msrb.mxu0 %v918_v26  ;;  %v958_v16 = vor.u32 %v1050_v11, %v957_v9 }
  0x41   :  { %655 = vmatpush.bf16.msrb.mxu2 %v930_v18  ;;  %v1049_v18 = vld [vmem:[#allocation6 + $0x16c] sm:$0xf] }
  0x42   :  { %v962_v20 = vor.u32 %v1049_v18, %v959_v19 }
  0x43   :  { %668 = vmatpush.bf16.msrb.mxu3 %v994_v22  ;;  %v1032_v22 = vld [vmem:[#allocation6 + $0x54] sm:$0xf0] }
  0x44   :  { %642 = vmatpush.bf16.msrb.mxu1 %v990_v15  ;;  %631 = vmatpush.bf16.msrb.mxu0 %v910_v45  ;;  %v886_v26 = vor.u32 %v1032_v22, %v885_v21  ;;  %v943_v45 = vld [vmem:[#allocation6 + $0x138] sm:$0xf0] }
  0x45   :  { %656 = vmatpush.bf16.msrb.mxu2 %v922_v35 }
  0x47   :  { %669 = vmatpush.bf16.msrb.mxu3 %v986_v37  ;;  %v941_v37 = vld [vmem:[#allocation6 + $0x128] sm:$0xf] }
  0x48   :  { %643 = vmatpush.bf16.msrb.mxu1 %v982_v27  ;;  %632 = vmatpush.bf16.msrb.mxu0 %v902_v61  ;;  %v1048_v27 = vld [vmem:[#allocation6 + $0x154] sm:$0xf0] }
  0x49   :  { %657 = vmatpush.bf16.msrb.mxu2 %v914_v47  ;;  %v950_v30 = vor.u32 %v1048_v27, %v949_v23  ;;  %v942_v47 = vor.u32 %v1046_v38, %v941_v37  ;;  %v688_v27 = vld [vmem:[%s1229_s5] sm:$0xf] }
  0x4a   :  { %690 = vst [vmem:[#allocation1] ss:$4 sm:$0xff] %v688_v27 }
  0x4b   :  { %670 = vmatpush.bf16.msrb.mxu3 %v978_v54  ;;  %v1044_v54 = vld [vmem:[#allocation6 + $0x114] sm:$0xf0] }
  0x4c   :  { %644 = vmatpush.bf16.msrb.mxu1 %v974_v46 }
  0x4d   :  { %658 = vmatpush.bf16.msrb.mxu2 %v906_v63 }
  0x4f   :  { %671 = vmatpush.bf16.msrb.mxu3 %v970_v4 }
  0x53   :  { %672 = vmatpush.bf16.msrb.mxu3 %v962_v20 }
  0x80   :  { %v66_v62 = vpop.permute.xlu0 %65 }
  0x81   :  { %v73_v31 = vmul.f32 %v66_v62, %v57_v8  ;;  %v74_v32 = vmul.f32 %v66_v62, %v58_v13  ;;  %v966_v62 = vor.u32 %v1052_v58, %v965_v57  ;;  %v1034_v8 = vld [vmem:[#allocation6 + $0x74] sm:$0xf0]  ;;  %v895_v13 = vld [vmem:[#allocation6 + $0x78] sm:$0xf0]  ;;  %v1043_v57 = vld [vmem:[#allocation6 + $0x10c] sm:$0xf] }
  0x82   :  { %v894_v10 = vor.u32 %v1034_v8, %v893_v7  ;;  %v898_v17 = vor.u32 %v1033_v12, %v895_v13  ;;  %v935_v58 = vld [vmem:[#allocation6 + $0x118] sm:$0xf0] }
  0x83   :  { %v77_v50 = vrot.slane %v73_v31, 4  ;;  %v83_v51 = vrot.slane %v74_v32, 4  ;;  %645 = vmatpush.bf16.msrb.mxu1 %v966_v62  ;;  %v874_v62 = vor.u32 %v1027_v55, %v871_v56 }
  0x84   :  { %633 = vmatpush.bf16.msrb.mxu0 %v894_v10  ;;  %659 = vmatpush.bf16.msrb.mxu2 %v898_v17 }
  0x85   :  { %v78_v2 = vadd.f32 %v77_v50, %v73_v31  ;;  %v84_v3 = vadd.f32 %v83_v51, %v74_v32  ;;  %v890_v31 = vor.u32 %v1031_v28, %v887_v29  ;;  %v1047_v32 = vld [vmem:[#allocation6 + $0x14c] sm:$0xf]  ;;  %v1028_v50 = vld [vmem:[#allocation6 + $0x14] sm:$0xf0]  ;;  %v933_v51 = vld [vmem:[#allocation6 + $0x108] sm:$0xf] }
  0x86   :  { %v870_v59 = vor.u32 %v1028_v50, %v869_v49  ;;  %v934_v61 = vor.u32 %v1044_v54, %v933_v51  ;;  %v466_v51 = vperm.slane %v463_v40, 1 }
  0x87   :  { %v79_v14 = vrot.slane %v78_v2, 2  ;;  %v85_v15 = vrot.slane %v84_v3, 2  ;;  %646 = vmatpush.bf16.msrb.mxu1 %v958_v16 }
  0x88   :  { %v71_v41 = vpop.permute.xlu0 %70  ;;  %634 = vmatpush.bf16.msrb.mxu0 %v886_v26  ;;  %660 = vmatpush.bf16.msrb.mxu2 %v890_v31 }
  0x89   :  { %v75_v52 = vmul.f32 %v71_v41, %v59_v33  ;;  %v76_v53 = vmul.f32 %v71_v41, %v60_v34  ;;  %v951_v33 = vld [vmem:[#allocation6 + $0x158] sm:$0xf0]  ;;  %v877_v34 = vld [vmem:[#allocation6 + $0x28] sm:$0xf]  ;;  %v1045_v41 = vld [vmem:[#allocation6 + $0x12c] sm:$0xf]  ;;  %v80_v46 = vadd.f32 %v79_v14, %v78_v2  ;;  %v938_v2 = vor.u32 %v1043_v57, %v935_v58 }
  0x8a   :  { %v954_v35 = vor.u32 %v1047_v32, %v951_v33  ;;  %v878_v44 = vor.u32 %v1030_v36, %v877_v34 }
  0x8b   :  { %v89_v5 = vrot.slane %v75_v52, 4  ;;  %v95_v6 = vrot.slane %v76_v53, 4  ;;  %647 = vmatpush.bf16.msrb.mxu1 %v950_v30  ;;  %v81_v60 = vrot.slane %v80_v46, 1  ;;  %v198_v30 = vld [vmem:[%s1228_s4] sm:$0x3] }
  0x8c   :  { %673 = vmatpush.bf16.msrb.mxu3 %v954_v35  ;;  %635 = vmatpush.bf16.msrb.mxu0 %v878_v44  ;;  %v200_v31 = vperm.slane %v198_v30, 0  ;;  %v201_v32 = vperm.slane %v198_v30, 1 }
  0x8d   :  { %v90_v24 = vadd.f32 %v89_v5, %v75_v52  ;;  %v96_v25 = vadd.f32 %v95_v6, %v76_v53  ;;  %v86_v52 = vadd.f32 %v85_v15, %v84_v3  ;;  %v946_v53 = vor.u32 %v1045_v41, %v943_v45  ;;  %661 = vmatpush.bf16.msrb.mxu2 %v882_v48 }
  0x8e   :  { %v82_v4 = vadd.f32 %v81_v60, %v80_v46 }
  0x8f   :  { %v91_v42 = vrot.slane %v90_v24, 2  ;;  %v97_v43 = vrot.slane %v96_v25, 2  ;;  %648 = vmatpush.bf16.msrb.mxu1 %v942_v47  ;;  %v87_v63 = vrot.slane %v86_v52, 1 }
  0x90   :  { %674 = vmatpush.bf16.msrb.mxu3 %v946_v53  ;;  %636 = vmatpush.bf16.msrb.mxu0 %v870_v59 }
  0x91   :  { %v92_v0 = vadd.f32 %v91_v42, %v90_v24  ;;  %v98_v1 = vadd.f32 %v97_v43, %v96_v25  ;;  %662 = vmatpush.bf16.msrb.mxu2 %v874_v62  ;;  %v88_v5 = vadd.f32 %v87_v63, %v86_v52  ;;  %v465_v43 = vperm.slane %v463_v40, 0 }
  0x93   :  { %649 = vmatpush.bf16.msrb.mxu1 %v934_v61  ;;  %v93_v6 = vrot.slane %v92_v0, 1  ;;  %v99_v7 = vrot.slane %v98_v1, 1 }
  0x94   :  { %675 = vmatpush.bf16.msrb.mxu3 %v938_v2 }
  0x95   :  { %v94_v10 = vadd.f32 %v93_v6, %v92_v0  ;;  %v100_v11 = vadd.f32 %v99_v7, %v98_v1  ;;  %v697_v7 = vstv %s1224_s0 }
  0x9f   :  { %v151_v3 = vpop.permute.xlu1 %150 }
  0xa0   :  { %v158_v8 = vmul.f32 %v151_v3, %v82_v4  ;;  %v159_v9 = vmul.f32 %v151_v3, %v88_v5  ;;  %v691_v3 = vld.sshfl [vmem:[#allocation1] sm:$0xff pattern:$0x73625140]  ;;  %v692_v4 = vld.sshfl [vmem:[#allocation1 + $0x8] sm:$0xff pattern:$0x73625140] }
  0xa2   :  { %v162_v13 = vpack.c.bf16 %v158_v8, %v158_v8  ;;  %v163_v14 = vpack.c.bf16 %v159_v9, %v159_v9 }
  0xa4   :  { %v208_v19 = vunpack.c.l.b16 %v162_v13  ;;  %v209_v20 = vunpack.c.l.b16 %v163_v14 }
  0xa7   :  { %v156_v12 = vpop.permute.xlu1 %155 }
  0xa8   :  { %v160_v15 = vmul.f32 %v156_v12, %v94_v10  ;;  %v161_v16 = vmul.f32 %v156_v12, %v100_v11 }
  0xaa   :  { %v164_v17 = vpack.c.bf16 %v160_v15, %v160_v15  ;;  %v165_v18 = vpack.c.bf16 %v161_v16, %v161_v16 }
  0xac   :  { %v210_v21 = vunpack.c.l.b16 %v164_v17  ;;  %v211_v22 = vunpack.c.l.b16 %v165_v18 }
  0xae   :  { %v213_v23 = vsel %vm212_vm9, %v210_v21, %v208_v19  ;;  %v214_v24 = vsel %vm212_vm9, %v211_v22, %v209_v20 }
  0xaf   :  { %v215_v25 = vpack.c.b16 %v213_v23, %v213_v23  ;;  %v216_v26 = vpack.c.b16 %v214_v24, %v214_v24 }
  0xb1   :  { %387 = vmatmul.bf16.vlgmr.msra.gmra.mxu0 %v215_v25  ;;  %400 = vmatmul.bf16.vlgmr.msra.gmra.mxu1 %v216_v26 }
  0xb2   :  { %413 = vmatmul.bf16.vlgmr.msra.gmra.mxu2 %v215_v25  ;;  %426 = vmatmul.bf16.vlgmr.msra.gmra.mxu3 %v216_v26 }
  0xc1   :  { %637 = vmatmul.bf16.vlgmr.msrb.gmra.mxu0 %v215_v25  ;;  %650 = vmatmul.bf16.vlgmr.msrb.gmra.mxu1 %v216_v26 }
  0xc2   :  { %663 = vmatmul.bf16.vlgmr.msrb.gmra.mxu2 %v215_v25  ;;  %676 = vmatmul.bf16.vlgmr.msrb.gmra.mxu3 %v216_v26 }
 0x12e   :  { %v388_v28 = vpop.f32.mrf.mxu0  ;;  %v401_v29 = vpop.f32.mrf.mxu1 }
 0x12f   :  { %v389_v35 = vadd.f32 %v388_v28, %v200_v31 }
 0x131   :  { %v402_v41 = vadd.f32 %v401_v29, %v389_v35 }
 0x135   :  { %v414_v33 = vpop.f32.mrf.mxu2  ;;  %v427_v34 = vpop.f32.mrf.mxu3 }
 0x136   :  { %v415_v36 = vadd.f32 %v414_v33, %v201_v32  ;;  %v390_v37 = vpop.f32.mrf.mxu0  ;;  %v403_v38 = vpop.f32.mrf.mxu1 }
 0x138   :  { %v428_v39 = vadd.f32 %v427_v34, %v415_v36 }
 0x13a   :  { %v711_v42 = vrot.slane %v428_v39, 6 }
 0x13c   :  { %v712_v44 = vsel %vm705_vm10, %v402_v41, %v711_v42 }
 0x13d   :  { %714 = vst [vmem:[#allocation8 + $0x4] sm:$0xf] %v712_v44  ;;  %v416_v45 = vpop.f32.mrf.mxu2  ;;  %v429_v46 = vpop.f32.mrf.mxu3 }
 0x13e   :  { %v638_v47 = vpop.f32.mrf.mxu0  ;;  %v651_v48 = vpop.f32.mrf.mxu1 }
 0x13f   :  { %v639_v49 = vadd.f32 %v638_v47, %v465_v43 }
 0x141   :  { %v652_v50 = vadd.f32 %v651_v48, %v639_v49 }
 0x143   :  { %v682_v52 = vmul.f32 0.5, %v652_v50 }
 0x145   :  { %v664_v53 = vpop.f32.mrf.mxu2  ;;  %v677_v54 = vpop.f32.mrf.mxu3  ;;  %v684_v55 = vmul.f32 1.442695, %v682_v52 }
 0x146   :  { %v665_v56 = vadd.f32 %v664_v53, %v466_v51  ;;  %v640_v57 = vpop.f32.mrf.mxu0  ;;  %v653_v58 = vpop.f32.mrf.mxu1 }
 0x147   :  { %1071 = vpow2.f32 %v684_v55 }
 0x148   :  { %v678_v59 = vadd.f32 %v677_v54, %v665_v56 }
 0x14a   :  { %v683_v60 = vmul.f32 0.5, %v678_v59  ;;  %v717_v61 = vrot.slane %v678_v59, 6 }
 0x14c   :  { %v686_v62 = vmul.f32 1.442695, %v683_v60  ;;  %v718_v63 = vsel %vm705_vm10, %v652_v50, %v717_v61 }
 0x14d   :  { %720 = vst [vmem:[#allocation8 + $0x8] sm:$0xf] %v718_v63  ;;  %v666_v0 = vpop.f32.mrf.mxu2  ;;  %v679_v1 = vpop.f32.mrf.mxu3 }
 0x14e   :  { %1073 = vpow2.f32 %v686_v62  ;;  %v1072_v2 = vpop.eup %1071 }
 0x14f   :  { %v695_v5 = vmul.f32 %v1072_v2, %v691_v3 }
 0x151   :  { %v698_v9 = vmul.f32 %v697_v7, %v695_v5 }
 0x153   :  { %v700_v12 = vadd.f32 %v698_v9, %v402_v41 }
 0x154   :  { %v1074_v6 = vpop.eup %1073 }
 0x155   :  { %v696_v8 = vmul.f32 %v1074_v6, %v692_v4 }
 0x157   :  { %v699_v10 = vmul.f32 %v697_v7, %v696_v8 }
 0x159   :  { %v701_v11 = vadd.f32 %v699_v10, %v428_v39 }
 0x15b   :  { %v704_v13 = vrot.slane %v701_v11, 6 }
 0x15d   :  { %v706_v14 = vsel %vm705_vm10, %v700_v12, %v704_v13 }
 0x15e   :  { %708 = vst [vmem:[#allocation8] sm:$0xf] %v706_v14 }
 0x15f   :  { %731 = dma.vmem_to_hbm [thread:$0]  %s727_s17, 192, %s729_s20, [#allocation5]  }
 0x160   :  { %1151 = dma.done.wait [#allocation5], 192  }
 0x161   :  { %1152 = vsyncadd [#allocation5], 4294967104 }
 0x162   :  { %736 = vsyncpa [#allocation4], 1 }
 0x163   :  { %737 = vsyncpa [#allocation7], 1 }
 0x164   :  { %738 = vsyncpa [#allocation5], 1 }

</bundles_post_ra>
